<compile_context>
chip_gen: v7x
topology: tpu7x:2x2x1
jax: 0.10.0
libtpu: 0.0.40
codegen_flags: <defaults>
</compile_context>

<pallas_src>
import jax
import jax.numpy as jnp
from jax.experimental import pallas as pl
from jax.experimental.pallas import tpu as pltpu

SIZE = 13  # module-level `size` from the PyTorch script


def _make_kernel(channels, size):
    """Build a kernel specialized on the (static) per-input channel counts."""
    channels = tuple(int(c) for c in channels)
    ctot = sum(channels)
    offs = [0]
    for c in channels:
        offs.append(offs[-1] + c)          # channel offset of each input in t1
    tail = ctot - size                      # rows surviving the slice
    # All interior segment boundaries 8-sublane aligned? -> unmasked per-input
    # stores are free; otherwise a single slab store is cheaper.
    aligned = all(o % 8 == 0 for o in offs[1:-1])

    def kernel(*refs):
        in_refs = refs[:-1]
        o_ref = refs[-1]

        # One vld per input; everything below reuses these vregs.
        vals = [r[...] for r in in_refs]

        # t1 lives only in vregs; the sublane concat/shift goes to the XLU and
        # never round-trips through VMEM scratch.
        need_t1 = (not aligned) or tail > 0
        t1 = None
        if need_t1:
            t1 = jnp.concatenate(vals, axis=1) if len(vals) > 1 else vals[0]

        # ---- t1 region: o[:, :ctot, :] ----
        if aligned:
            # Every boundary is 8-aligned: per-input stores carry no vst.msk
            # boundaries and reuse the already-loaded vregs directly.
            for v, off, c in zip(vals, offs, channels):
                o_ref[:, off:off + c, :] = v
        else:
            # One contiguous slab: at most one masked head + one masked tail
            # in total, regardless of the number / alignment of cat inputs.
            o_ref[:, :ctot, :] = t1

        # ---- t3 region: o[:, ctot:, :] = t1[:, size:, :] ----
        if tail > 0:
            # Slice the vreg-resident t1 (sublane shift, XLU) and emit the
            # whole tail as ONE contiguous store.
            o_ref[:, ctot:ctot + tail, :] = t1[:, size:, :]

    return kernel


def cat_slice_cat(inputs, size=SIZE):
    """Fused cat -> slice -> cat over a list of (B, C_i, L) arrays."""
    # Zero-channel inputs contribute nothing; drop them up front.
    inputs = [x for x in inputs if x.shape[1] > 0]
    assert len(inputs) >= 1
    B, _, L = inputs[0].shape
    dtype = inputs[0].dtype
    channels = []
    for x in inputs:
        assert x.ndim == 3 and x.shape[0] == B and x.shape[2] == L
        assert x.dtype == dtype
        channels.append(int(x.shape[1]))
    ctot = sum(channels)
    assert ctot > 0
    assert 0 <= size <= ctot, "slice offset must lie within the cat dimension"
    cout = ctot + (ctot - size)

    kernel = _make_kernel(channels, size)

    itemsize = jnp.dtype(dtype).itemsize
    cost = pl.CostEstimate(
        flops=0,
        transcendentals=0,
        bytes_accessed=B * L * itemsize * (ctot + cout),
    )

    # Batch grid: per-step blocks are one batch row of each input / output.
    # Blocks keep the full (C_i, L) extents, so the (8,128) divisibility rule
    # is satisfied trivially; "parallel" lets megacore/2-TC chips split B.
    grid_spec = pltpu.PrefetchScalarGridSpec(
        num_scalar_prefetch=0,
        grid=(B,),
        in_specs=[pl.BlockSpec((1, c, L), lambda b: (b, 0, 0)) for c in channels],
        out_specs=pl.BlockSpec((1, cout, L), lambda b: (b, 0, 0)),
    )

    return pl.pallas_call(
        kernel,
        out_shape=jax.ShapeDtypeStruct((B, cout, L), dtype),
        grid_spec=grid_spec,
        compiler_params=pltpu.CompilerParams(dimension_semantics=("parallel",)),
        cost_estimate=cost,
    )(*inputs)


def model_forward(*args):
    """Mirrors Model.forward: uses only the first half of the args."""
    n = len(args) // 2
    l1 = args[:n]
    return cat_slice_cat(l1, SIZE)


if __name__ == "__main__":
    key = jax.random.PRNGKey(0)
    k1, k2, k3, k4 = jax.random.split(key, 4)

    B, C, L = 2, 16, 128
    # Four args -> n = 2, l1 = (a1, a2), l2 = (a3, a4) (unused by forward).
    a1 = jax.random.normal(k1, (B, C, L), dtype=jnp.float32)
    a2 = jax.random.normal(k2, (B, C, L), dtype=jnp.float32)
    a3 = jax.random.normal(k3, (B, C, L), dtype=jnp.float32)
    a4 = jax.random.normal(k4, (B, C, L), dtype=jnp.float32)

    out = model_forward(a1, a2, a3, a4)
    out = jax.block_until_ready(out)

    # Pure-JAX reference of the same (well-defined) pattern.
    t1 = jnp.concatenate([a1, a2], axis=1)
    t3 = t1[:, SIZE:, :]
    ref = jnp.concatenate([t1, t3], axis=1)

    assert out.shape == ref.shape == (B, 2 * (2 * C) - SIZE, L), out.shape
    assert jnp.allclose(out, ref), "mismatch vs reference"
    print("KERNEL_OK")
</pallas_src>

<mosaic_0001>
module attributes {stable_mosaic.version = 11 : i64} {
  func.func @kernel(%arg0: i32, %arg1: memref<1x16x128xf32, #tpu.memory_space<vmem>>, %arg2: memref<1x16x128xf32, #tpu.memory_space<vmem>>, %arg3: memref<1x51x128xf32, #tpu.memory_space<vmem>>) attributes {dimension_semantics = [#tpu.dimension_semantics<parallel>], iteration_bounds = array<i64: 2>, scalar_prefetch = 0 : i64, scratch_operands = 0 : i64, tpu.core_type = #tpu.core_type<tc>, window_params = [{transform_indices = @transform_0, window_bounds = array<i64: 1, 16, 128>}, {transform_indices = @transform_1, window_bounds = array<i64: 1, 16, 128>}, {transform_indices = @transform_2, window_bounds = array<i64: 1, 51, 128>}]} {
    %c0 = arith.constant 0 : index
    %c0_0 = arith.constant 0 : index
    %c0_1 = arith.constant 0 : index
    %0 = vector.load %arg1[%c0, %c0_0, %c0_1] : memref<1x16x128xf32, #tpu.memory_space<vmem>>, vector<1x16x128xf32>
    %c0_2 = arith.constant 0 : index
    %c0_3 = arith.constant 0 : index
    %c0_4 = arith.constant 0 : index
    %1 = vector.load %arg2[%c0_2, %c0_3, %c0_4] : memref<1x16x128xf32, #tpu.memory_space<vmem>>, vector<1x16x128xf32>
    %2 = tpu.concatenate %0, %1 in 1 : vector<1x16x128xf32>, vector<1x16x128xf32> -> vector<1x32x128xf32>
    %c0_5 = arith.constant 0 : index
    %c0_6 = arith.constant 0 : index
    %c0_7 = arith.constant 0 : index
    %3 = vector.load %arg3[%c0_5, %c0_6, %c0_7] : memref<1x51x128xf32, #tpu.memory_space<vmem>>, vector<1x16x128xf32>
    tpu.vector_store %arg3[%c0_5, %c0_6, %c0_7], %0 {strides = array<i32>} : memref<1x51x128xf32, #tpu.memory_space<vmem>>, vector<1x16x128xf32>,
    %c0_8 = arith.constant 0 : index
    %c16 = arith.constant 16 : index
    %c0_9 = arith.constant 0 : index
    %4 = vector.load %arg3[%c0_8, %c16, %c0_9] : memref<1x51x128xf32, #tpu.memory_space<vmem>>, vector<1x16x128xf32>
    tpu.vector_store %arg3[%c0_8, %c16, %c0_9], %1 {strides = array<i32>} : memref<1x51x128xf32, #tpu.memory_space<vmem>>, vector<1x16x128xf32>,
    %5 = vector.extract_strided_slice %2 {offsets = [0, 13, 0], sizes = [1, 19, 128], strides = [1, 1, 1]} : vector<1x32x128xf32> to vector<1x19x128xf32>
    %c0_10 = arith.constant 0 : index
    %c32 = arith.constant 32 : index
    %c0_11 = arith.constant 0 : index
    %6 = vector.load %arg3[%c0_10, %c32, %c0_11] : memref<1x51x128xf32, #tpu.memory_space<vmem>>, vector<1x19x128xf32>
    tpu.vector_store %arg3[%c0_10, %c32, %c0_11], %5 {strides = array<i32>} : memref<1x51x128xf32, #tpu.memory_space<vmem>>, vector<1x19x128xf32>,
    return
  }
  func.func @transform_0(%arg0: i32) -> (i32, i32, i32) {
    %c0_i32 = arith.constant 0 : i32
    %c0_i32_0 = arith.constant 0 : i32
    %c0_i32_1 = arith.constant 0 : i32
    return %arg0, %c0_i32, %c0_i32_0 : i32, i32, i32
  }
  func.func @transform_1(%arg0: i32) -> (i32, i32, i32) {
    %c0_i32 = arith.constant 0 : i32
    %c0_i32_0 = arith.constant 0 : i32
    %c0_i32_1 = arith.constant 0 : i32
    return %arg0, %c0_i32, %c0_i32_0 : i32, i32, i32
  }
  func.func @transform_2(%arg0: i32) -> (i32, i32, i32) {
    %c0_i32 = arith.constant 0 : i32
    %c0_i32_0 = arith.constant 0 : i32
    %c0_i32_1 = arith.constant 0 : i32
    return %arg0, %c0_i32, %c0_i32_0 : i32, i32, i32
  }
}

</mosaic_0001>

<bundles_post_ra>
// kernel: tpu_custom_call.1
= control target key start
LH: loop header
LB: loop body
LE: loop exit
PB: predicated region body
PF: predicated region fallthrough
CT: control target
= control target key end

     0   :  { %7 = vsyncpa [#allocation3], 0  ;;  %s656_s0 = inlined_call_operand.hbm [shape: f32[2,16,128], index: 0, kind: input, shape index: {}]   ;;  %s657_s1 = inlined_call_operand.hbm [shape: f32[2,16,128], index: 1, kind: input, shape index: {}]   ;;  %s658_s2 = inlined_call_operand.vmem [shape: f32[2,51,128], index: 2, kind: output, shape index: {}]  }
   0x1   :  { %9 = vsyncpa [#allocation3 + $0x1], 0 }
   0x2   :  { %10 = vsyncpa [#allocation5], 0 }
   0x3   :  { %12 = vsyncpa [#allocation5 + $0x1], 0  ;;  %s488_s9 = smov 0   ;;  %s490_s10 = smov 0  }
   0x4   :  { %s492_s11 = smov 0   ;;  %s494_s12 = smov 0  }
   0x5 LB: > { %s507_s13 = sadd.s32 4294967295, %s467_s12   ;;  %s510_s14 = sadd.s32 1, %s467_s12   ;;  %s467_s12 = sphi %s494_s12, %s668_s12   ;;  %s463_s11 = sphi %s492_s11, %s667_s11   ;;  %s459_s10 = sphi %s490_s10, %s666_s10   ;;  %s455_s9 = sphi %s488_s9, %s665_s9  }
   0x6   : > { %s22_s15 = ssub.s32 %s467_s12, %s510_s14  ;;  %s25_s16 = sadd.s32 1, %s463_s11 }
   0x7   : > { %p23_p0 = scmp.eq.s32.totalorder %s22_s15, 0  ;;  %p32_p1 = scmp.ne.s32.totalorder %s463_s11, %s459_s10 }
   0x8   : > { %p33_p2 = scmp.eq.s32.totalorder %s467_s12, 0  ;;  %p38_p3 = scmp.ne.s32.totalorder %s459_s10, %s455_s9 }
   0x9   : > { %s520_s17 = scalar_select %p23_p0, %s463_s11, %s25_s16  }
   0xa   : > { %p34_p4 = por %p33_p2, %p32_p1  ;;  %p39_p5 = scmp.eq.s32.totalorder %s507_s13, 0 }
   0xb   : > { %p334_p6 = scmp.lt.s32.totalorder %s467_s12, 2  ;;  %s529_s19 = sand.u32 1, %s463_s11  }
   0xc   : > { %p524_p7 = por %p39_p5, %p38_p3  ;;  %s308_s20 = sshll.u32 %s529_s19, 4 }
   0xd   : > { %s320_s21 = sshll.u32 %s467_s12, 8  ;;  %s118_s25 = scalar_lea.vmem [#allocation2], %s308_s20 }
   0xe   : > { %s660_s18 = scalar_select %p524_p7, 1, 0 }
   0xf   : > { %s538_s24 = scalar_lea.hbm %s656_s0, %s320_s21  ;;  %s125_s26 = sshll.u32 %s118_s25, 4  ;;  %s542_s26 = int_to_ptr.vmem [resolvable:$true] %s125_s26 }
  0x10   : > { %p544_p8 = pnand %p334_p6, %p34_p4  ;;  %s115_s28 = scalar_lea.sflag [#allocation3], %s529_s19 }
  0x11   : > { %s369_s29 = scalar_lea.hbm %s538_s24, 256  ;;  %s374_s4 = scalar_lea.hbm %s656_s0, 512 }
  0x12   : > { %p370_p10 = scmp.ne.s32.totalorder %s538_s24, %s369_s29  ;;  %p371_p11 = pneg %p544_p8 }
  0x13   : > { %p375_p0 = scmp.lt.u32.totalorder %s538_s24, %s656_s0  ;;  %p376_p1 = scmp.lt.u32.totalorder %s374_s4, %s369_s29 }
  0x14   : > { %p372_p12 = pnand %p371_p11, %p370_p10  ;;  %p378_p3 = scmp.lt.u32.totalorder %s369_s29, %s538_s24 }
  0x15   : > { %p377_p2 = por %p376_p1, %p375_p0 }
  0x16   : > { %p373_p13 = pneg %p372_p12 }
  0x17   : > { %p379_p4 = por %p378_p3, %p377_p2 }
  0x19   : > { %p380_p5 = pnand %p379_p4, %p373_p13 }
  0x1b   : > { %383 = shalt.err (!%p380_p5)
}
  0x1c   : > { %s384_s7 = scalar_lea.vmem %s542_s26, 256  ;;  %s469_s8 = smov [#allocation2]  }
  0x1d   : > { %p385_p6 = scmp.ne.s32.totalorder %s542_s26, %s384_s7  ;;  %s389_s9 = sshll.u32 %s469_s8, 4  ;;  %s390_s9 = int_to_ptr.vmem [resolvable:$false] %s389_s9 }
  0x1e   : > { %s391_s15 = scalar_lea.vmem %s390_s9, 512  ;;  %p392_p9 = scmp.lt.s32.totalorder %s542_s26, %s390_s9 }
  0x1f   : > { %p387_p10 = pnand %p385_p6, %p371_p11  ;;  %p393_p0 = scmp.lt.s32.totalorder %s391_s15, %s384_s7 }
  0x21   : > { %p388_p12 = pneg %p387_p10  ;;  %p394_p1 = por %p393_p0, %p392_p9 }
  0x23   : > { %p395_p2 = pnand %p394_p1, %p388_p12 }
  0x25   : > { %398 = shalt.err (!%p395_p2)
}
  0x26   : > { %s470_s16 = smov 128   ;;  %s471_s22 = smov 8  }
  0x27   : > { %330 = dma.hbm_to_vmem [thread:$0]  (!%p544_p8), %s538_s24, 256, %s542_s26, %s115_s28, %s470_s16, %s470_s16, %s471_s22  }
  0x28   : > { %p154_p9 = scmp.lt.s32.totalorder %s467_s12, 3  ;;  %s586_s29 = scalar_lea.hbm %s657_s1, %s320_s21 }
  0x29   : > { %p662_p13 = scmp.ge.s32.totalorder %s467_s12, 1  ;;  %s139_s3 = scalar_lea.vmem [#allocation4], %s308_s20 }
  0x2a   : > { %s146_s4 = sshll.u32 %s139_s3, 4  ;;  %s136_s24 = scalar_lea.sflag [#allocation5], %s529_s19  ;;  %s596_s4 = int_to_ptr.vmem [resolvable:$true] %s146_s4 }
  0x2b   : > { %p590_p3 = pnand %p662_p13, %p154_p9  ;;  %s399_s26 = scalar_lea.hbm %s586_s29, 256 }
  0x2c   : > { %p400_p4 = scmp.ne.s32.totalorder %s586_s29, %s399_s26  ;;  %s404_s28 = scalar_lea.hbm %s657_s1, 512 }
  0x2d   : > { %p405_p10 = scmp.lt.u32.totalorder %s586_s29, %s657_s1  ;;  %p406_p12 = scmp.lt.u32.totalorder %s404_s28, %s399_s26 }
  0x2e   : > { %p402_p5 = pnand %p400_p4, %p371_p11  ;;  %p408_p1 = scmp.lt.u32.totalorder %s399_s26, %s586_s29 }
  0x2f   : > { %p407_p0 = por %p406_p12, %p405_p10 }
  0x30   : > { %p403_p6 = pneg %p402_p5 }
  0x31   : > { %p409_p2 = por %p408_p1, %p407_p0 }
  0x33   : > { %p410_p9 = pnand %p409_p2, %p403_p6 }
  0x35   : > { %413 = shalt.err (!%p410_p9)
}
  0x36   : > { %s414_s20 = scalar_lea.vmem %s596_s4, 256  ;;  %s472_s7 = smov [#allocation4]  }
  0x37   : > { %p415_p13 = scmp.ne.s32.totalorder %s596_s4, %s414_s20  ;;  %s419_s8 = sshll.u32 %s472_s7, 4  ;;  %s420_s8 = int_to_ptr.vmem [resolvable:$false] %s419_s8 }
  0x38   : > { %s421_s9 = scalar_lea.vmem %s420_s8, 512  ;;  %p422_p7 = scmp.lt.s32.totalorder %s596_s4, %s420_s8 }
  0x39   : > { %p417_p4 = pnand %p415_p13, %p371_p11  ;;  %p423_p10 = scmp.lt.s32.totalorder %s421_s9, %s414_s20 }
  0x3b   : > { %p418_p5 = pneg %p417_p4  ;;  %p424_p12 = por %p423_p10, %p422_p7 }
  0x3d   : > { %p425_p0 = pnand %p424_p12, %p418_p5 }
  0x3f   : > { %428 = shalt.err (!%p425_p0)
}
  0x40   : > { %333 = dma.hbm_to_vmem [thread:$0]  (!%p544_p8), %s586_s29, 256, %s596_s4, %s136_s24, %s470_s16, %s470_s16, %s471_s22  }
  0x41   : > { %158 = sbr.rel (%p590_p3) target bundleno = 85 (0x55), region = 28  ;;  %s160_s15 = sand.u32 (!%p590_p3), 1, %s459_s10  }
  0x42   : > { %s315_s23 = sshll.u32 (!%p590_p3), %s160_s15, 4  ;;  %s161_s25 = scalar_lea.sflag (!%p590_p3), [#allocation3], %s160_s15 }
  0x43   : > { %s164_s3 = scalar_lea.vmem (!%p590_p3), [#allocation2], %s315_s23  ;;  %p664_p7 = scmp.ne.s32.totalorder (!%p590_p3), %s660_s18, 0 }
  0x48   : > { %446 = dma.done.wait (%p664_p7), %s161_s25, 256  }
  0x49   : > { %448 = vsyncadd (%p664_p7), %s161_s25, 4294967040  ;;  %s170_s27 = scalar_lea.sflag [#allocation5], %s160_s15  ;;  %s173_s19 = scalar_lea.vmem [#allocation4], %s315_s23 }
  0x4a   : > { %450 = dma.done.wait (%p664_p7), %s170_s27, 256  }
  0x4b   : > { %452 = vsyncadd (%p664_p7), %s170_s27, 4294967040  ;;  %p199_p8 = scmp.lt.s32.totalorder %s507_s13, 1  ;;  %v204_v0 = vld [vmem:[%s164_s3] sm:$0xff]  ;;  %v205_v1 = vld [vmem:[%s164_s3 + $0x8] sm:$0xff] }
  0x4c   : > { %v206_v2 = vld [vmem:[%s173_s19] sm:$0xff]  ;;  %v207_v3 = vld [vmem:[%s173_s19 + $0x8] sm:$0xff] }
  0x4d   : > { %s670_s13 = smov (!%p199_p8, %s507_s13), 1 }
  0x4e   : > { %s322_s16 = smul.u32 56, %s670_s13 }
  0x50   : > { %s203_s30 = scalar_lea.vmem %s658_s2, %s322_s16 }
  0x51   : > { %208 = vst [vmem:[%s203_s30] sm:$0xff] %v204_v0  ;;  %209 = vst [vmem:[%s203_s30 + $0x8] sm:$0xff] %v205_v1 }
  0x52   : > { %212 = vst [vmem:[%s203_s30 + $0x1b] sm:$0xe0] %v205_v1  ;;  %210 = vst [vmem:[%s203_s30 + $0x10] sm:$0xff] %v206_v2 }
  0x53   : > { %213 = vst [vmem:[%s203_s30 + $0x23] sm:$0xff] %v206_v2  ;;  %211 = vst [vmem:[%s203_s30 + $0x18] sm:$0xff] %v207_v3 }
  0x54   : > { %214 = vst [vmem:[%s203_s30 + $0x2b] sm:$0xff] %v207_v3 }
  0x55 PF: > { %p15_p11 = scmp.ge.s32.totalorder %s510_s14, 4   ;;  %s665_s9 = smov %s459_s10 }
  0x56   : > { %s666_s10 = smov %s463_s11  ;;  %s667_s11 = smov %s520_s17 }
  0x57   : > { %s668_s12 = smov %s510_s14  ;;  %17 = sbr.rel (!%p15_p11) target bundleno = 5 (0x5), region = 81 }
  0x5e   :  { %236 = vsyncpa [#allocation3], 1 }
  0x5f   :  { %238 = vsyncpa [#allocation3 + $0x1], 1 }
  0x60   :  { %239 = vsyncpa [#allocation5], 1 }
  0x61   :  { %241 = vsyncpa [#allocation5 + $0x1], 1 }

</bundles_post_ra>
